<compile_context>
chip_gen: v7x
topology: tpu7x:2x2x1
jax: 0.10.0
libtpu: 0.0.40
codegen_flags: <defaults>
</compile_context>

<pallas_src>
import functools

import jax
import jax.numpy as jnp
from jax.experimental import pallas as pl
from jax.experimental.pallas import tpu as pltpu

MAX_PIXEL_TILE = 8192   # lane-tile cap for the geometry kernel
MAX_POINT_TILE = 2048   # row-tile cap for the per-point linear head


def _pick_pixel_tile(hw, cap=MAX_PIXEL_TILE):
    """Largest multiple of 128 that divides hw, capped. Memory-bound kernel:
    bigger lane tiles amortize per-grid-step overhead and keep stores lane-dense."""
    assert hw % 128 == 0, "flattened pixel count must be a multiple of 128"
    best, t = 128, 128
    limit = min(cap, hw)
    while t <= limit:
        if hw % t == 0:
            best = t
        t += 128
    return best


# ----------------------------------------------------------------------------
# Kernel 1: fused depth back-projection + voxelization
# ----------------------------------------------------------------------------
def _backproject_voxelize_kernel(n_vox, voxel_size, dw_f, sx, sy, tile,
                                 kinv_ref, rt_ref, tvec_ref, origin_ref,   # SMEM
                                 depth_ref,                                # VMEM in
                                 world_ref, idx_ref):                      # VMEM out
    j = pl.program_id(0)      # pixel-tile index (outer, many steps)
    v = pl.program_id(1)      # view index

    # --- homogeneous pixel coords generated in-kernel (no HBM stream) -------
    lane = jax.lax.broadcasted_iota(jnp.int32, (1, tile), 1)
    flat = (lane + j * tile).astype(jnp.float32)          # flattened pixel id
    row = jnp.floor(flat / dw_f)
    row = jnp.where(row * dw_f > flat, row - 1.0, row)    # fix fp rounding at edges
    col = flat - row * dw_f
    u = col * sx                                           # image-space x
    vv = row * sy                                          # image-space y

    d = depth_ref[0]                                       # (1, TILE) depth
    x = u * d
    y = vv * d
    z = d                                                  # homogeneous 1 * depth

    def mat3_apply(m_ref, a, b, c):
        r0 = m_ref[v, 0] * a + m_ref[v, 1] * b + m_ref[v, 2] * c
        r1 = m_ref[v, 3] * a + m_ref[v, 4] * b + m_ref[v, 5] * c
        r2 = m_ref[v, 6] * a + m_ref[v, 7] * b + m_ref[v, 8] * c
        return r0, r1, r2

    # camera frame: K^-1 @ (pix * depth) - t
    cx, cy, cz = mat3_apply(kinv_ref, x, y, z)
    cx = cx - tvec_ref[v, 0]
    cy = cy - tvec_ref[v, 1]
    cz = cz - tvec_ref[v, 2]

    # world frame: R^T @ cam
    wx, wy, wz = mat3_apply(rt_ref, cx, cy, cz)

    # direct row stores (no concatenate)
    world_ref[0, 0:1, :] = wx
    world_ref[0, 1:2, :] = wy
    world_ref[0, 2:3, :] = wz

    # voxelize
    inv_vox = 1.0 / voxel_size
    ix = jnp.clip(jnp.floor((wx - origin_ref[0]) * inv_vox).astype(jnp.int32), 0, n_vox - 1)
    iy = jnp.clip(jnp.floor((wy - origin_ref[1]) * inv_vox).astype(jnp.int32), 0, n_vox - 1)
    iz = jnp.clip(jnp.floor((wz - origin_ref[2]) * inv_vox).astype(jnp.int32), 0, n_vox - 1)
    idx_ref[0, 0:1, :] = ix
    idx_ref[0, 1:2, :] = iy
    idx_ref[0, 2:3, :] = iz


def backproject_and_voxelize(depth_m, img_size, depth_hw, K_inv_flat, R_T_flat,
                             tvec_m, origin, voxel_size, n_vox):
    n_mid, HW = depth_m.shape
    dh, dw = depth_hw
    ih, iw = img_size
    tile = _pick_pixel_tile(HW)
    depth_3d = depth_m.reshape(n_mid, 1, HW)
    grid = (HW // tile, n_mid)          # pixel-tile outer -> megacore friendly
    smem = pl.BlockSpec(memory_space=pltpu.MemorySpace.SMEM)

    kern = functools.partial(
        _backproject_voxelize_kernel, n_vox, float(voxel_size),
        float(dw), float(iw) / float(dw), float(ih) / float(dh), tile)

    world, idx = pl.pallas_call(
        kern,
        grid=grid,
        in_specs=[smem, smem, smem, smem,
                  pl.BlockSpec((1, 1, tile), lambda j, v: (v, 0, j))],
        out_specs=[pl.BlockSpec((1, 3, tile), lambda j, v: (v, 0, j)),
                   pl.BlockSpec((1, 3, tile), lambda j, v: (v, 0, j))],
        out_shape=[jax.ShapeDtypeStruct((n_mid, 3, HW), jnp.float32),
                   jax.ShapeDtypeStruct((n_mid, 3, HW), jnp.int32)],
        compiler_params=pltpu.CompilerParams(
            dimension_semantics=("parallel", "parallel")),
    )(K_inv_flat, R_T_flat, tvec_m, origin, depth_3d)
    return world, idx


# ----------------------------------------------------------------------------
# Kernel 2: per-point linear head (dense stand-in for the AnchorSCNN decoder)
#           tiled over points, bf16 MXU matmul with f32 accumulation
# ----------------------------------------------------------------------------
def _pointwise_linear_kernel(x_ref, w_ref, b_ref, o_ref):
    o_ref[...] = (jnp.dot(x_ref[...], w_ref[...],
                          preferred_element_type=jnp.float32) + b_ref[...])


def pointwise_linear(x, w, b, tn_max=MAX_POINT_TILE):
    N, Cin = x.shape
    Cout = w.shape[1]
    tn = min(tn_max, max(8, ((N + 7) // 8) * 8))        # sublane-aligned row tile
    n_pad = ((N + tn - 1) // tn) * tn
    if n_pad != N:
        x = jnp.pad(x, ((0, n_pad - N), (0, 0)))
    xb = x.astype(jnp.bfloat16)                         # halve dominant read traffic
    wb = w.astype(jnp.bfloat16)
    bf = b.reshape(1, Cout).astype(jnp.float32)

    out = pl.pallas_call(
        _pointwise_linear_kernel,
        grid=(n_pad // tn,),
        in_specs=[pl.BlockSpec((tn, Cin), lambda i: (i, 0)),
                  pl.BlockSpec((Cin, Cout), lambda i: (0, 0)),   # resident
                  pl.BlockSpec((1, Cout), lambda i: (0, 0))],    # resident
        out_specs=pl.BlockSpec((tn, Cout), lambda i: (i, 0)),
        out_shape=jax.ShapeDtypeStruct((n_pad, Cout), jnp.float32),
        compiler_params=pltpu.CompilerParams(dimension_semantics=("parallel",)),
    )(xb, wb, bf)
    return out[:N]


# ----------------------------------------------------------------------------
# Forward wrapper (glue in plain JAX)
# ----------------------------------------------------------------------------
def _build_img_pts(img_size, dh, dw):
    """geo.batched_build_img_pts_tensor equivalent (used only as reference in
    the self-check; the kernel generates this grid in-kernel). Returns (3, dh*dw)."""
    ih, iw = img_size
    ys, xs = jnp.meshgrid(jnp.arange(dh, dtype=jnp.float32) * (ih / dh),
                          jnp.arange(dw, dtype=jnp.float32) * (iw / dw),
                          indexing="ij")
    return jnp.stack([xs.reshape(-1), ys.reshape(-1),
                      jnp.ones((dh * dw,), jnp.float32)], axis=0)


def anchor_feature_decoder_forward(depth, img_size, rotmats, tvecs, K, feat,
                                   up_coords, interval, origin,
                                   scale=0, n_vox=24, w=None, b=None):
    n_views, dh, dw = depth.shape
    HW = dh * dw
    # The PyTorch module uses views [2:-2] for camera params; slice depth the
    # same way so the batched transform is shape-consistent.
    depth_m = depth[2:-2].reshape(-1, HW).astype(jnp.float32)
    n_mid = depth_m.shape[0]
    K_inv = jnp.linalg.inv(K[2:-2]).astype(jnp.float32)
    R_T = jnp.transpose(rotmats[2:-2], (0, 2, 1)).astype(jnp.float32)
    tvec_m = tvecs[2:-2].astype(jnp.float32)

    voxel_size = 0.04 * (2 ** scale)
    world, idx = backproject_and_voxelize(
        depth_m, img_size, (dh, dw),
        K_inv.reshape(n_mid, 9), R_T.reshape(n_mid, 9), tvec_m,
        origin.astype(jnp.float32), voxel_size, n_vox)

    pts_world = jnp.transpose(world, (0, 2, 1)).reshape(-1, 3)        # (N, 3)
    anchor_idx3d = jnp.transpose(idx, (0, 2, 1)).reshape(-1, 3)       # (N, 3) int32
    # TODO(synk): geo.voxelize de-duplicates anchor voxels (unique) and drops
    #             out-of-volume points; here all points are kept and clamped.
    anchor_idx4d = jnp.concatenate(
        [jnp.zeros((anchor_idx3d.shape[0], 1), jnp.int32), anchor_idx3d], axis=1)

    # Nearest-voxel gather of GRU features as a dense stand-in for
    # ME.MinkowskiInterpolation.
    # TODO(synk): sparse trilinear interpolation (MinkowskiInterpolation) not
    #             translated; duplicate voxel coords resolve last-write-wins here.
    c = feat.shape[1]
    vox_coords = jnp.clip((up_coords[:, 1:4] / interval).astype(jnp.int32), 0, n_vox - 1)
    dense = jnp.zeros((n_vox, n_vox, n_vox, c), jnp.float32).at[
        vox_coords[:, 0], vox_coords[:, 1], vox_coords[:, 2]].set(feat.astype(jnp.float32))
    anchor_feat = dense[anchor_idx3d[:, 0], anchor_idx3d[:, 1], anchor_idx3d[:, 2]]

    # TODO(synk): AnchorSCNN (torchsparse point-voxel CNN) and sparse_tensor_summation
    #             have no dense Pallas equivalent; a deterministic per-point linear
    #             head stands in.
    out_feat = pointwise_linear(anchor_feat, w, b)
    return out_feat, anchor_idx4d, pts_world


# ----------------------------------------------------------------------------
if __name__ == "__main__":
    key = jax.random.PRNGKey(0)
    k1, k2, k3, k4, k5, k6 = jax.random.split(key, 6)

    n_views, dh, dw = 6, 16, 16           # 2 "middle" views actually used
    img_size = (64, 64)
    in_dim, out_dim, n_vox, scale = 32, 16, 24, 0

    depth = jax.random.uniform(k1, (n_views, dh, dw), jnp.float32, 0.5, 2.5)
    rotmats = jnp.tile(jnp.eye(3, dtype=jnp.float32), (n_views, 1, 1))
    tvecs = jax.random.normal(k2, (n_views, 3), jnp.float32) * 0.1
    K = jnp.tile(jnp.array([[48.0, 0.0, 32.0],
                            [0.0, 48.0, 32.0],
                            [0.0, 0.0, 1.0]], jnp.float32), (n_views, 1, 1))

    n_sparse = 256
    feat = jax.random.normal(k3, (n_sparse, in_dim), jnp.float32)
    # unique voxel coordinates -> deterministic dense scatter
    flat_ids = jax.random.permutation(k4, n_vox ** 3)[:n_sparse]
    vox_xyz = jnp.stack([flat_ids // (n_vox * n_vox),
                         (flat_ids // n_vox) % n_vox,
                         flat_ids % n_vox], axis=1)
    interval = 1.0
    up_coords = jnp.concatenate(
        [jnp.zeros((n_sparse, 1), jnp.float32),
         vox_xyz.astype(jnp.float32) * interval], axis=1)
    origin = jnp.array([-0.5, -0.5, 0.0], jnp.float32)

    # deterministic parameters for the linear head (AnchorSCNN stand-in)
    w = jax.random.normal(k5, (in_dim, out_dim), jnp.float32) * 0.05
    b = jax.random.normal(k6, (out_dim,), jnp.float32) * 0.01

    out_feat, anchor_idx4d, pts_world = anchor_feature_decoder_forward(
        depth, img_size, rotmats, tvecs, K, feat, up_coords,
        interval, origin, scale=scale, n_vox=n_vox, w=w, b=b)
    jax.block_until_ready((out_feat, anchor_idx4d, pts_world))

    # ---- cross-check the Pallas geometry path against plain JAX -------------
    n_mid = n_views - 4
    depth_m = depth[2:-2].reshape(n_mid, -1)
    pts_grid = _build_img_pts(img_size, dh, dw)
    pd = pts_grid[None] * depth_m[:, None, :]
    cam = jnp.einsum("vij,vjn->vin", jnp.linalg.inv(K[2:-2]), pd) - tvecs[2:-2][:, :, None]
    world_ref = jnp.einsum("vij,vjn->vin", jnp.transpose(rotmats[2:-2], (0, 2, 1)), cam)
    world_ref = jnp.transpose(world_ref, (0, 2, 1)).reshape(-1, 3)
    assert jnp.allclose(pts_world, world_ref, atol=1e-3), "geometry kernel mismatch"

    # ---- cross-check the linear head against plain JAX ----------------------
    anchor_idx3d = anchor_idx4d[:, 1:]
    vox_coords = jnp.clip((up_coords[:, 1:4] / interval).astype(jnp.int32), 0, n_vox - 1)
    dense_ref = jnp.zeros((n_vox, n_vox, n_vox, in_dim), jnp.float32).at[
        vox_coords[:, 0], vox_coords[:, 1], vox_coords[:, 2]].set(feat)
    anchor_feat_ref = dense_ref[anchor_idx3d[:, 0], anchor_idx3d[:, 1], anchor_idx3d[:, 2]]
    out_ref = anchor_feat_ref @ w + b
    assert jnp.allclose(out_feat, out_ref, atol=5e-2), "linear head mismatch"

    print("KERNEL_OK")
</pallas_src>

<mosaic_0001>
module attributes {stable_mosaic.version = 11 : i64} {
  func.func @_backproject_voxelize_kernel(%arg0: i32, %arg1: i32, %arg2: memref<2x9xf32, #tpu.memory_space<smem>>, %arg3: memref<2x9xf32, #tpu.memory_space<smem>>, %arg4: memref<2x3xf32, #tpu.memory_space<smem>>, %arg5: memref<3xf32, #tpu.memory_space<smem>>, %arg6: memref<1x1x256xf32, #tpu.memory_space<vmem>>, %arg7: memref<1x3x256xf32, #tpu.memory_space<vmem>>, %arg8: memref<1x3x256xi32, #tpu.memory_space<vmem>>) attributes {dimension_semantics = [#tpu.dimension_semantics<parallel>, #tpu.dimension_semantics<parallel>], iteration_bounds = array<i64: 1, 2>, scalar_prefetch = 0 : i64, scratch_operands = 0 : i64, tpu.core_type = #tpu.core_type<tc>, window_params = [{transform_indices = @transform_0, window_bounds = array<i64: 2, 9>}, {transform_indices = @transform_1, window_bounds = array<i64: 2, 9>}, {transform_indices = @transform_2, window_bounds = array<i64: 2, 3>}, {transform_indices = @transform_3, window_bounds = array<i64: 3>}, {transform_indices = @transform_4, window_bounds = array<i64: 1, 1, 256>}, {transform_indices = @transform_5, window_bounds = array<i64: 1, 3, 256>}, {transform_indices = @transform_6, window_bounds = array<i64: 1, 3, 256>}]} {
    %0 = tpu.iota {dimensions = array<i32: 1>} : vector<1x256xi32>
    %c256_i32 = arith.constant 256 : i32
    %1 = arith.muli %arg0, %c256_i32 : i32
    %2 = vector.broadcast %1 : i32 to vector<1x256xi32>
    %3 = arith.addi %0, %2 : vector<1x256xi32>
    %4 = arith.sitofp %3 : vector<1x256xi32> to vector<1x256xf32>
    %cst = arith.constant 1.600000e+01 : f32
    %5 = vector.broadcast %cst : f32 to vector<1x256xf32>
    %6 = arith.divf %4, %5 : vector<1x256xf32>
    %7 = math.floor %6 : vector<1x256xf32>
    %cst_0 = arith.constant 1.600000e+01 : f32
    %8 = vector.broadcast %cst_0 : f32 to vector<1x256xf32>
    %9 = arith.mulf %7, %8 : vector<1x256xf32>
    %10 = arith.cmpf ogt, %9, %4 : vector<1x256xf32>
    %cst_1 = arith.constant 1.000000e+00 : f32
    %11 = vector.broadcast %cst_1 : f32 to vector<1x256xf32>
    %12 = arith.subf %7, %11 : vector<1x256xf32>
    %13 = arith.select %10, %12, %7 : vector<1x256xi1>, vector<1x256xf32>
    %cst_2 = arith.constant 1.600000e+01 : f32
    %14 = vector.broadcast %cst_2 : f32 to vector<1x256xf32>
    %15 = arith.mulf %13, %14 : vector<1x256xf32>
    %16 = arith.subf %4, %15 : vector<1x256xf32>
    %cst_3 = arith.constant 4.000000e+00 : f32
    %17 = vector.broadcast %cst_3 : f32 to vector<1x256xf32>
    %18 = arith.mulf %16, %17 : vector<1x256xf32>
    %cst_4 = arith.constant 4.000000e+00 : f32
    %19 = vector.broadcast %cst_4 : f32 to vector<1x256xf32>
    %20 = arith.mulf %13, %19 : vector<1x256xf32>
    %c0 = arith.constant 0 : index
    %c0_5 = arith.constant 0 : index
    %c0_6 = arith.constant 0 : index
    %21 = vector.load %arg6[%c0, %c0_5, %c0_6] : memref<1x1x256xf32, #tpu.memory_space<vmem>>, vector<1x1x256xf32>
    %22 = vector.shape_cast %21 : vector<1x1x256xf32> to vector<1x256xf32>
    %23 = arith.mulf %18, %22 : vector<1x256xf32>
    %24 = arith.mulf %20, %22 : vector<1x256xf32>
    %25 = arith.index_cast %arg1 : i32 to index
    %c0_7 = arith.constant 0 : index
    %26 = memref.load %arg2[%25, %c0_7] : memref<2x9xf32, #tpu.memory_space<smem>>
    %27 = vector.broadcast %26 : f32 to vector<1x256xf32>
    %28 = arith.mulf %27, %23 : vector<1x256xf32>
    %29 = arith.index_cast %arg1 : i32 to index
    %c1 = arith.constant 1 : index
    %30 = memref.load %arg2[%29, %c1] : memref<2x9xf32, #tpu.memory_space<smem>>
    %31 = vector.broadcast %30 : f32 to vector<1x256xf32>
    %32 = arith.mulf %31, %24 : vector<1x256xf32>
    %33 = arith.addf %28, %32 : vector<1x256xf32>
    %34 = arith.index_cast %arg1 : i32 to index
    %c2 = arith.constant 2 : index
    %35 = memref.load %arg2[%34, %c2] : memref<2x9xf32, #tpu.memory_space<smem>>
    %36 = vector.broadcast %35 : f32 to vector<1x256xf32>
    %37 = arith.mulf %36, %22 : vector<1x256xf32>
    %38 = arith.addf %33, %37 : vector<1x256xf32>
    %39 = arith.index_cast %arg1 : i32 to index
    %c3 = arith.constant 3 : index
    %40 = memref.load %arg2[%39, %c3] : memref<2x9xf32, #tpu.memory_space<smem>>
    %41 = vector.broadcast %40 : f32 to vector<1x256xf32>
    %42 = arith.mulf %41, %23 : vector<1x256xf32>
    %43 = arith.index_cast %arg1 : i32 to index
    %c4 = arith.constant 4 : index
    %44 = memref.load %arg2[%43, %c4] : memref<2x9xf32, #tpu.memory_space<smem>>
    %45 = vector.broadcast %44 : f32 to vector<1x256xf32>
    %46 = arith.mulf %45, %24 : vector<1x256xf32>
    %47 = arith.addf %42, %46 : vector<1x256xf32>
    %48 = arith.index_cast %arg1 : i32 to index
    %c5 = arith.constant 5 : index
    %49 = memref.load %arg2[%48, %c5] : memref<2x9xf32, #tpu.memory_space<smem>>
    %50 = vector.broadcast %49 : f32 to vector<1x256xf32>
    %51 = arith.mulf %50, %22 : vector<1x256xf32>
    %52 = arith.addf %47, %51 : vector<1x256xf32>
    %53 = arith.index_cast %arg1 : i32 to index
    %c6 = arith.constant 6 : index
    %54 = memref.load %arg2[%53, %c6] : memref<2x9xf32, #tpu.memory_space<smem>>
    %55 = vector.broadcast %54 : f32 to vector<1x256xf32>
    %56 = arith.mulf %55, %23 : vector<1x256xf32>
    %57 = arith.index_cast %arg1 : i32 to index
    %c7 = arith.constant 7 : index
    %58 = memref.load %arg2[%57, %c7] : memref<2x9xf32, #tpu.memory_space<smem>>
    %59 = vector.broadcast %58 : f32 to vector<1x256xf32>
    %60 = arith.mulf %59, %24 : vector<1x256xf32>
    %61 = arith.addf %56, %60 : vector<1x256xf32>
    %62 = arith.index_cast %arg1 : i32 to index
    %c8 = arith.constant 8 : index
    %63 = memref.load %arg2[%62, %c8] : memref<2x9xf32, #tpu.memory_space<smem>>
    %64 = vector.broadcast %63 : f32 to vector<1x256xf32>
    %65 = arith.mulf %64, %22 : vector<1x256xf32>
    %66 = arith.addf %61, %65 : vector<1x256xf32>
    %67 = arith.index_cast %arg1 : i32 to index
    %c0_8 = arith.constant 0 : index
    %68 = memref.load %arg4[%67, %c0_8] : memref<2x3xf32, #tpu.memory_space<smem>>
    %69 = vector.broadcast %68 : f32 to vector<1x256xf32>
    %70 = arith.subf %38, %69 : vector<1x256xf32>
    %71 = arith.index_cast %arg1 : i32 to index
    %c1_9 = arith.constant 1 : index
    %72 = memref.load %arg4[%71, %c1_9] : memref<2x3xf32, #tpu.memory_space<smem>>
    %73 = vector.broadcast %72 : f32 to vector<1x256xf32>
    %74 = arith.subf %52, %73 : vector<1x256xf32>
    %75 = arith.index_cast %arg1 : i32 to index
    %c2_10 = arith.constant 2 : index
    %76 = memref.load %arg4[%75, %c2_10] : memref<2x3xf32, #tpu.memory_space<smem>>
    %77 = vector.broadcast %76 : f32 to vector<1x256xf32>
    %78 = arith.subf %66, %77 : vector<1x256xf32>
    %79 = arith.index_cast %arg1 : i32 to index
    %c0_11 = arith.constant 0 : index
    %80 = memref.load %arg3[%79, %c0_11] : memref<2x9xf32, #tpu.memory_space<smem>>
    %81 = vector.broadcast %80 : f32 to vector<1x256xf32>
    %82 = arith.mulf %81, %70 : vector<1x256xf32>
    %83 = arith.index_cast %arg1 : i32 to index
    %c1_12 = arith.constant 1 : index
    %84 = memref.load %arg3[%83, %c1_12] : memref<2x9xf32, #tpu.memory_space<smem>>
    %85 = vector.broadcast %84 : f32 to vector<1x256xf32>
    %86 = arith.mulf %85, %74 : vector<1x256xf32>
    %87 = arith.addf %82, %86 : vector<1x256xf32>
    %88 = arith.index_cast %arg1 : i32 to index
    %c2_13 = arith.constant 2 : index
    %89 = memref.load %arg3[%88, %c2_13] : memref<2x9xf32, #tpu.memory_space<smem>>
    %90 = vector.broadcast %89 : f32 to vector<1x256xf32>
    %91 = arith.mulf %90, %78 : vector<1x256xf32>
    %92 = arith.addf %87, %91 : vector<1x256xf32>
    %93 = arith.index_cast %arg1 : i32 to index
    %c3_14 = arith.constant 3 : index
    %94 = memref.load %arg3[%93, %c3_14] : memref<2x9xf32, #tpu.memory_space<smem>>
    %95 = vector.broadcast %94 : f32 to vector<1x256xf32>
    %96 = arith.mulf %95, %70 : vector<1x256xf32>
    %97 = arith.index_cast %arg1 : i32 to index
    %c4_15 = arith.constant 4 : index
    %98 = memref.load %arg3[%97, %c4_15] : memref<2x9xf32, #tpu.memory_space<smem>>
    %99 = vector.broadcast %98 : f32 to vector<1x256xf32>
    %100 = arith.mulf %99, %74 : vector<1x256xf32>
    %101 = arith.addf %96, %100 : vector<1x256xf32>
    %102 = arith.index_cast %arg1 : i32 to index
    %c5_16 = arith.constant 5 : index
    %103 = memref.load %arg3[%102, %c5_16] : memref<2x9xf32, #tpu.memory_space<smem>>
    %104 = vector.broadcast %103 : f32 to vector<1x256xf32>
    %105 = arith.mulf %104, %78 : vector<1x256xf32>
    %106 = arith.addf %101, %105 : vector<1x256xf32>
    %107 = arith.index_cast %arg1 : i32 to index
    %c6_17 = arith.constant 6 : index
    %108 = memref.load %arg3[%107, %c6_17] : memref<2x9xf32, #tpu.memory_space<smem>>
    %109 = vector.broadcast %108 : f32 to vector<1x256xf32>
    %110 = arith.mulf %109, %70 : vector<1x256xf32>
    %111 = arith.index_cast %arg1 : i32 to index
    %c7_18 = arith.constant 7 : index
    %112 = memref.load %arg3[%111, %c7_18] : memref<2x9xf32, #tpu.memory_space<smem>>
    %113 = vector.broadcast %112 : f32 to vector<1x256xf32>
    %114 = arith.mulf %113, %74 : vector<1x256xf32>
    %115 = arith.addf %110, %114 : vector<1x256xf32>
    %116 = arith.index_cast %arg1 : i32 to index
    %c8_19 = arith.constant 8 : index
    %117 = memref.load %arg3[%116, %c8_19] : memref<2x9xf32, #tpu.memory_space<smem>>
    %118 = vector.broadcast %117 : f32 to vector<1x256xf32>
    %119 = arith.mulf %118, %78 : vector<1x256xf32>
    %120 = arith.addf %115, %119 : vector<1x256xf32>
    %c0_20 = arith.constant 0 : index
    %c0_21 = arith.constant 0 : index
    %c0_22 = arith.constant 0 : index
    %121 = vector.load %arg7[%c0_20, %c0_21, %c0_22] : memref<1x3x256xf32, #tpu.memory_space<vmem>>, vector<1x1x256xf32>
    %122 = vector.shape_cast %121 : vector<1x1x256xf32> to vector<1x256xf32>
    %123 = vector.shape_cast %92 : vector<1x256xf32> to vector<1x1x256xf32>
    tpu.vector_store %arg7[%c0_20, %c0_21, %c0_22], %123 {strides = array<i32>} : memref<1x3x256xf32, #tpu.memory_space<vmem>>, vector<1x1x256xf32>,
    %c0_23 = arith.constant 0 : index
    %c1_24 = arith.constant 1 : index
    %c0_25 = arith.constant 0 : index
    %124 = vector.load %arg7[%c0_23, %c1_24, %c0_25] : memref<1x3x256xf32, #tpu.memory_space<vmem>>, vector<1x1x256xf32>
    %125 = vector.shape_cast %124 : vector<1x1x256xf32> to vector<1x256xf32>
    %126 = vector.shape_cast %106 : vector<1x256xf32> to vector<1x1x256xf32>
    tpu.vector_store %arg7[%c0_23, %c1_24, %c0_25], %126 {strides = array<i32>} : memref<1x3x256xf32, #tpu.memory_space<vmem>>, vector<1x1x256xf32>,
    %c0_26 = arith.constant 0 : index
    %c2_27 = arith.constant 2 : index
    %c0_28 = arith.constant 0 : index
    %127 = vector.load %arg7[%c0_26, %c2_27, %c0_28] : memref<1x3x256xf32, #tpu.memory_space<vmem>>, vector<1x1x256xf32>
    %128 = vector.shape_cast %127 : vector<1x1x256xf32> to vector<1x256xf32>
    %129 = vector.shape_cast %120 : vector<1x256xf32> to vector<1x1x256xf32>
    tpu.vector_store %arg7[%c0_26, %c2_27, %c0_28], %129 {strides = array<i32>} : memref<1x3x256xf32, #tpu.memory_space<vmem>>, vector<1x1x256xf32>,
    %c0_29 = arith.constant 0 : index
    %130 = memref.load %arg5[%c0_29] : memref<3xf32, #tpu.memory_space<smem>>
    %131 = vector.broadcast %130 : f32 to vector<1x256xf32>
    %132 = arith.subf %92, %131 : vector<1x256xf32>
    %cst_30 = arith.constant 2.500000e+01 : f32
    %133 = vector.broadcast %cst_30 : f32 to vector<1x256xf32>
    %134 = arith.mulf %132, %133 : vector<1x256xf32>
    %135 = math.floor %134 : vector<1x256xf32>
    %136 = arith.fptosi %135 : vector<1x256xf32> to vector<1x256xi32>
    %c0_i32 = arith.constant 0 : i32
    %c23_i32 = arith.constant 23 : i32
    %137 = vector.broadcast %c0_i32 : i32 to vector<1x256xi32>
    %138 = arith.maxsi %137, %136 : vector<1x256xi32>
    %139 = vector.broadcast %c23_i32 : i32 to vector<1x256xi32>
    %140 = arith.minsi %139, %138 : vector<1x256xi32>
    %c1_31 = arith.constant 1 : index
    %141 = memref.load %arg5[%c1_31] : memref<3xf32, #tpu.memory_space<smem>>
    %142 = vector.broadcast %141 : f32 to vector<1x256xf32>
    %143 = arith.subf %106, %142 : vector<1x256xf32>
    %cst_32 = arith.constant 2.500000e+01 : f32
    %144 = vector.broadcast %cst_32 : f32 to vector<1x256xf32>
    %145 = arith.mulf %143, %144 : vector<1x256xf32>
    %146 = math.floor %145 : vector<1x256xf32>
    %147 = arith.fptosi %146 : vector<1x256xf32> to vector<1x256xi32>
    %c0_i32_33 = arith.constant 0 : i32
    %c23_i32_34 = arith.constant 23 : i32
    %148 = vector.broadcast %c0_i32_33 : i32 to vector<1x256xi32>
    %149 = arith.maxsi %148, %147 : vector<1x256xi32>
    %150 = vector.broadcast %c23_i32_34 : i32 to vector<1x256xi32>
    %151 = arith.minsi %150, %149 : vector<1x256xi32>
    %c2_35 = arith.constant 2 : index
    %152 = memref.load %arg5[%c2_35] : memref<3xf32, #tpu.memory_space<smem>>
    %153 = vector.broadcast %152 : f32 to vector<1x256xf32>
    %154 = arith.subf %120, %153 : vector<1x256xf32>
    %cst_36 = arith.constant 2.500000e+01 : f32
    %155 = vector.broadcast %cst_36 : f32 to vector<1x256xf32>
    %156 = arith.mulf %154, %155 : vector<1x256xf32>
    %157 = math.floor %156 : vector<1x256xf32>
    %158 = arith.fptosi %157 : vector<1x256xf32> to vector<1x256xi32>
    %c0_i32_37 = arith.constant 0 : i32
    %c23_i32_38 = arith.constant 23 : i32
    %159 = vector.broadcast %c0_i32_37 : i32 to vector<1x256xi32>
    %160 = arith.maxsi %159, %158 : vector<1x256xi32>
    %161 = vector.broadcast %c23_i32_38 : i32 to vector<1x256xi32>
    %162 = arith.minsi %161, %160 : vector<1x256xi32>
    %c0_39 = arith.constant 0 : index
    %c0_40 = arith.constant 0 : index
    %c0_41 = arith.constant 0 : index
    %163 = vector.load %arg8[%c0_39, %c0_40, %c0_41] : memref<1x3x256xi32, #tpu.memory_space<vmem>>, vector<1x1x256xi32>
    %164 = vector.shape_cast %163 : vector<1x1x256xi32> to vector<1x256xi32>
    %165 = vector.shape_cast %140 : vector<1x256xi32> to vector<1x1x256xi32>
    tpu.vector_store %arg8[%c0_39, %c0_40, %c0_41], %165 {strides = array<i32>} : memref<1x3x256xi32, #tpu.memory_space<vmem>>, vector<1x1x256xi32>,
    %c0_42 = arith.constant 0 : index
    %c1_43 = arith.constant 1 : index
    %c0_44 = arith.constant 0 : index
    %166 = vector.load %arg8[%c0_42, %c1_43, %c0_44] : memref<1x3x256xi32, #tpu.memory_space<vmem>>, vector<1x1x256xi32>
    %167 = vector.shape_cast %166 : vector<1x1x256xi32> to vector<1x256xi32>
    %168 = vector.shape_cast %151 : vector<1x256xi32> to vector<1x1x256xi32>
    tpu.vector_store %arg8[%c0_42, %c1_43, %c0_44], %168 {strides = array<i32>} : memref<1x3x256xi32, #tpu.memory_space<vmem>>, vector<1x1x256xi32>,
    %c0_45 = arith.constant 0 : index
    %c2_46 = arith.constant 2 : index
    %c0_47 = arith.constant 0 : index
    %169 = vector.load %arg8[%c0_45, %c2_46, %c0_47] : memref<1x3x256xi32, #tpu.memory_space<vmem>>, vector<1x1x256xi32>
    %170 = vector.shape_cast %169 : vector<1x1x256xi32> to vector<1x256xi32>
    %171 = vector.shape_cast %162 : vector<1x256xi32> to vector<1x1x256xi32>
    tpu.vector_store %arg8[%c0_45, %c2_46, %c0_47], %171 {strides = array<i32>} : memref<1x3x256xi32, #tpu.memory_space<vmem>>, vector<1x1x256xi32>,
    return
  }
  func.func @transform_0(%arg0: i32, %arg1: i32) -> (i32, i32) {
    %c0_i32 = arith.constant 0 : i32
    %c0_i32_0 = arith.constant 0 : i32
    %c0_i32_1 = arith.constant 0 : i32
    return %c0_i32, %c0_i32_0 : i32, i32
  }
  func.func @transform_1(%arg0: i32, %arg1: i32) -> (i32, i32) {
    %c0_i32 = arith.constant 0 : i32
    %c0_i32_0 = arith.constant 0 : i32
    %c0_i32_1 = arith.constant 0 : i32
    return %c0_i32, %c0_i32_0 : i32, i32
  }
  func.func @transform_2(%arg0: i32, %arg1: i32) -> (i32, i32) {
    %c0_i32 = arith.constant 0 : i32
    %c0_i32_0 = arith.constant 0 : i32
    %c0_i32_1 = arith.constant 0 : i32
    return %c0_i32, %c0_i32_0 : i32, i32
  }
  func.func @transform_3(%arg0: i32, %arg1: i32) -> i32 {
    %c0_i32 = arith.constant 0 : i32
    %c0_i32_0 = arith.constant 0 : i32
    return %c0_i32 : i32
  }
  func.func @transform_4(%arg0: i32, %arg1: i32) -> (i32, i32, i32) {
    %c0_i32 = arith.constant 0 : i32
    %c0_i32_0 = arith.constant 0 : i32
    return %arg1, %c0_i32, %arg0 : i32, i32, i32
  }
  func.func @transform_5(%arg0: i32, %arg1: i32) -> (i32, i32, i32) {
    %c0_i32 = arith.constant 0 : i32
    %c0_i32_0 = arith.constant 0 : i32
    return %arg1, %c0_i32, %arg0 : i32, i32, i32
  }
  func.func @transform_6(%arg0: i32, %arg1: i32) -> (i32, i32, i32) {
    %c0_i32 = arith.constant 0 : i32
    %c0_i32_0 = arith.constant 0 : i32
    return %arg1, %c0_i32, %arg0 : i32, i32, i32
  }
}

</mosaic_0001>

<bundles_post_ra>
// kernel: tpu_custom_call.1
= control target key start
LH: loop header
LB: loop body
LE: loop exit
PB: predicated region body
PF: predicated region fallthrough
CT: control target
= control target key end

     0   :  { %12 = vsyncpa [#allocation3], 0  ;;  %s1472_s0 = inlined_call_operand.hbm [shape: f32[2,9], index: 0, kind: input, shape index: {}]   ;;  %s1473_s1 = inlined_call_operand.vmem [shape: f32[2,9], index: 1, kind: input, shape index: {}]   ;;  %s1474_s2 = inlined_call_operand.hbm [shape: f32[2,3], index: 2, kind: input, shape index: {}]   ;;  %s1475_s3 = inlined_call_operand.vmem [shape: f32[3], index: 3, kind: input, shape index: {}]   ;;  %s1476_s4 = inlined_call_operand.vmem [shape: f32[2,1,256], index: 4, kind: input, shape index: {}]   ;;  %s1477_s5 = inlined_call_operand.vmem [shape: f32[2,3,256], index: 5, kind: output, shape index: {0}]   ;;  %s1478_s6 = inlined_call_operand.vmem [shape: s32[2,3,256], index: 6, kind: output, shape index: {1}]  }
   0x1   :  { %13 = vsyncpa [#allocation4], 0 }
   0x2   :  { %14 = vsyncpa [#allocation7], 0 }
   0x3   :  { %15 = vsyncpa [#allocation9], 0  ;;  %s1144_s21 = smov 0   ;;  %s1146_s22 = smov 0  }
   0x4   :  { %s1148_s23 = smov 0  }
   0x5 LB: > { %s899_s24 = sadd.s32 4294967295, %s1102_s23   ;;  %s30_s25 = sadd.s32 1, %s1098_s22  ;;  %s1102_s23 = sphi %s1148_s23, %s21_s23   ;;  %s1098_s22 = sphi %s1146_s22, %s1485_s22   ;;  %s1094_s21 = sphi %s1144_s21, %s1484_s21  }
   0x6   : > { %p31_p0 = scmp.ge.s32.totalorder %s30_s25, 2  ;;  %p901_p1 = scmp.ge.s32.totalorder %s1102_s23, 1 }
   0x7   : > { %p206_p2 = scmp.lt.s32.totalorder %s1102_s23, 3  ;;  %p1169_p4 = scmp.eq.s32.totalorder %s899_s24, 0 }
   0x8   : > { %s1487_s25 = smov (%p31_p0, %s30_s25), 0  ;;  %s228_s30 = sshll.u32 %s1473_s1, 4  ;;  %s229_s30 = int_to_ptr.vmem [resolvable:$true] %s228_s30 }
   0x9   : > { %p1165_p3 = pnand %p901_p1, %p206_p2  ;;  %s248_s10 = sshll.u32 %s1475_s3, 4  ;;  %s1187_s10 = int_to_ptr.vmem [resolvable:$true] %s248_s10 }
   0xa   : > { %s1008_s13 = scalar_lea.hbm %s1472_s0, 32 }
   0xb   : > { %p958_p5 = pneg %p1165_p3  ;;  %p1009_p7 = scmp.ne.s32.totalorder %s1472_s0, %s1008_s13 }
   0xc   : > { %p1015_p11 = scmp.lt.u32.totalorder %s1008_s13, %s1472_s0 }
   0xd   : > { %p1180_p6 = pnand %p1169_p4, %p958_p5 }
   0xf   : > { %p1010_p8 = pneg %p1180_p6 }
  0x11   : > { %p1011_p9 = pnand %p1010_p8, %p1009_p7 }
  0x13   : > { %p1012_p10 = pneg %p1011_p9 }
  0x15   : > { %p1017_p12 = pnand %p1015_p11, %p1012_p10 }
  0x17   : > { %1020 = shalt.err (!%p1017_p12)
}
  0x18   : > { %s1104_s18 = smov [#allocation2]   ;;  %s1021_s24 = scalar_lea.vmem %s229_s30, 32 }
  0x19   : > { %961 = dma.hbm_to_smem (!%p1180_p6), %s1472_s0, 32, %s1104_s18, [#allocation3]  }
  0x1a   : > { %p1022_p13 = scmp.ne.s32.totalorder %s229_s30, %s1021_s24  ;;  %p1029_p2 = scmp.lt.s32.totalorder %s229_s30, %s229_s30 }
  0x1b   : > { %p1030_p5 = scmp.lt.s32.totalorder %s1021_s24, %s1021_s24 }
  0x1c   : > { %p1024_p0 = pnand %p1022_p13, %p1010_p8 }
  0x1d   : > { %p1031_p7 = por %p1030_p5, %p1029_p2 }
  0x1e   : > { %p1025_p1 = pneg %p1024_p0 }
  0x20   : > { %p1032_p9 = pnand %p1031_p7, %p1025_p1 }
  0x22   : > { %1035 = shalt.err (!%p1032_p9)
}
  0x23   : > { %s1105_s28 = smov [#allocation5]   ;;  %s1036_s9 = scalar_lea.hbm %s1474_s2, 32 }
  0x24   : > { %964 = dma.vmem_to_smem (!%p1180_p6), %s229_s30, 32, %s1105_s28, [#allocation4]  }
  0x25   : > { %p1037_p10 = scmp.ne.s32.totalorder %s1474_s2, %s1036_s9  ;;  %p1043_p13 = scmp.lt.u32.totalorder %s1036_s9, %s1474_s2 }
  0x27   : > { %p1039_p11 = pnand %p1037_p10, %p1010_p8 }
  0x29   : > { %p1040_p12 = pneg %p1039_p11 }
  0x2b   : > { %p1045_p0 = pnand %p1043_p13, %p1040_p12 }
  0x2d   : > { %1048 = shalt.err (!%p1045_p0)
}
  0x2e   : > { %s1106_s15 = smov [#allocation6]   ;;  %s1049_s17 = scalar_lea.vmem %s1187_s10, 16 }
  0x2f   : > { %967 = dma.hbm_to_smem (!%p1180_p6), %s1474_s2, 32, %s1106_s15, [#allocation7]  }
  0x30   : > { %p1050_p1 = scmp.ne.s32.totalorder %s1187_s10, %s1049_s17  ;;  %p1057_p7 = scmp.lt.s32.totalorder %s1187_s10, %s1187_s10 }
  0x31   : > { %p1058_p9 = scmp.lt.s32.totalorder %s1049_s17, %s1049_s17 }
  0x32   : > { %p1052_p2 = pnand %p1050_p1, %p1010_p8 }
  0x33   : > { %p1059_p10 = por %p1058_p9, %p1057_p7 }
  0x34   : > { %p1053_p5 = pneg %p1052_p2 }
  0x36   : > { %p1060_p11 = pnand %p1059_p10, %p1053_p5 }
  0x38   : > { %1063 = shalt.err (!%p1060_p11)
}
  0x39   : > { %s1107_s18 = smov [#allocation8]   ;;  %273 = sbr.rel (%p1165_p3) target bundleno = 141 (0x8d), region = 40 }
  0x3a   : > { %970 = dma.vmem_to_smem (!%p1180_p6), %s1187_s10, 16, %s1107_s18, [#allocation9]  }
  0x40   : > { %1077 = dma.done.wait (%p1169_p4), [#allocation3], 32  }
  0x41   : > { %1079 = vsyncadd (%p1169_p4), [#allocation3], 4294967264 }
  0x42   : > { %1081 = dma.done.wait (%p1169_p4), [#allocation4], 32  }
  0x43   : > { %1083 = vsyncadd (%p1169_p4), [#allocation4], 4294967264 }
  0x44   : > { %1085 = dma.done.wait (%p1169_p4), [#allocation7], 32  }
  0x45   : > { %1087 = vsyncadd (%p1169_p4), [#allocation7], 4294967264 }
  0x46   : > { %1089 = dma.done.wait (%p1169_p4), [#allocation9], 16  }
  0x47   : > { %1091 = vsyncadd (%p1169_p4), [#allocation9], 4294967280 }
  0x48   : > { %291 = sfence }
  0x49   : > { %p333_p3 = scmp.lt.s32.totalorder %s1094_s21, 1  ;;  %v361_v0 = vlaneseq  ;;  %s1260_s26 = sshll.u32 %s1094_s21, 7  ;;  %v1108_v3 = vmov 1966171168  }
  0x4a   : > { %s1263_s7 = sadd.s32 1, %s1260_s26  ;;  %s1271_s27 = sadd.s32 2, %s1260_s26  ;;  %v558_v4 = vunpack.c.l.s4 %v1108_v3 }
  0x4b   : > { %s1489_s21 = smov (!%p333_p3, %s1094_s21), 1  ;;  %v362_v1 = vand.u32 127, %v361_v0  ;;  %v394_v2 = vshrl.u32 %v361_v0, 7  ;;  %s1275_s19 = sld [smem:[#allocation2 + %s1260_s26]]  ;;  %vm1411_vm2 = vcmp.lt.s32.totalorder %v361_v0, 256 }
  0x4c   : > { %s912_s10 = sshll.u32 %s1489_s21, 1  ;;  %s1281_s29 = sld [smem:[#allocation2 + %s1263_s7]]  ;;  %v559_v11 = vunpack.c.0.s8 %v558_v4 }
  0x4d   : > { %v363_v5 = vadd.s32 128, %v362_v1  ;;  %v368_v6 = vcvt.s32.f32 %v362_v1  ;;  %s339_s28 = scalar_lea.vmem %s1476_s4, %s912_s10  ;;  %s1286_s8 = sld [smem:[#allocation2 + %s1271_s27]]  ;;  %v1289_v9 = vsub.s32 0, %v394_v2  ;;  %v1291_v10 = vsub.s32 1, %v394_v2 }
  0x4e   : > { %s436_s9 = sadd.s32 3, %s1260_s26  ;;  %s441_s12 = sadd.s32 4, %s1260_s26  ;;  %v1299_v14 = vld [vmem:[%s339_s28] sm:$0x3]  ;;  %v1325_v20 = vsub.s32 %v559_v11, %v394_v2 }
  0x4f   : > { %v1283_v7 = vcvt.s32.f32 %v363_v5  ;;  %v371_v8 = vmul.f32 0.0625, %v368_v6  ;;  %s1295_s11 = sld [smem:[#allocation2 + %s436_s9]]  ;;  %s448_s14 = sadd.s32 5, %s1260_s26  ;;  %v396_v18 = vrot.slane %v1299_v14, %v1289_v9  ;;  %v400_v19 = vrot.slane %v1299_v14, %v1291_v10 }
  0x50   : > { %s1303_s13 = sld [smem:[#allocation2 + %s441_s12]]  ;;  %s465_s30 = sadd.s32 6, %s1260_s26 }
  0x51   : > { %v372_v12 = vmul.f32 0.0625, %v1283_v7  ;;  %v373_v13 = vfloor.f32 %v371_v8  ;;  %s1308_s15 = sld [smem:[#allocation2 + %s448_s14]]  ;;  %s470_s17 = sadd.s32 7, %s1260_s26  ;;  %v409_v25 = vstv %s1275_s19 }
  0x52   : > { %s1313_s16 = sld [smem:[#allocation2 + %s465_s30]]  ;;  %s477_s10 = sadd.s32 8, %s1260_s26  ;;  %v414_v26 = vstv %s1281_s29 }
  0x53   : > { %v374_v15 = vfloor.f32 %v372_v12  ;;  %v375_v16 = vmul.f32 16.0, %v373_v13  ;;  %v917_v17 = vadd.f32 -1.0, %v373_v13  ;;  %s1322_s18 = sld [smem:[#allocation2 + %s470_s17]]  ;;  %v421_v23 = vstv %s1286_s8 }
  0x54   : > { %s1330_s20 = sld [smem:[#allocation2 + %s477_s10]]  ;;  %v1335_v27 = vmul.f32 %v421_v23, %v1299_v14 }
  0x55   : > { %v376_v21 = vmul.f32 16.0, %v374_v15  ;;  %vm377_vm0 = vcmp.gt.f32.partialorder %v375_v16, %v368_v6  ;;  %v918_v22 = vadd.f32 -1.0, %v374_v15  ;;  %s1338_s24 = sld [smem:[#allocation6 + %s1260_s26]]  ;;  %v438_v30 = vstv %s1295_s11 }
  0x56   : > { %v381_v24 = vsel %vm377_vm0, %v917_v17, %v373_v13  ;;  %s1341_s28 = sld [smem:[#allocation6 + %s1263_s7]]  ;;  %v427_v32 = vrot.slane %v1335_v27, %v1289_v9  ;;  %v443_v33 = vstv %s1303_s13  ;;  %v431_v39 = vrot.slane %v1335_v27, %v1291_v10 }
  0x57   : > { %vm378_vm1 = vcmp.gt.f32.partialorder %v376_v21, %v1283_v7  ;;  %v383_v28 = vmul.f32 16.0, %v381_v24  ;;  %v389_v29 = vmul.f32 4.0, %v381_v24  ;;  %s1346_s8 = sld [smem:[#allocation6 + %s1271_s27]]  ;;  %v450_v34 = vstv %s1308_s15 }
  0x58   : > { %v382_v31 = vsel %vm378_vm1, %v918_v22, %v374_v15  ;;  %s1353_s19 = sld [smem:[#allocation5 + %s1260_s26]]  ;;  %v451_v40 = vmul.f32 %v450_v34, %v1299_v14  ;;  %v467_v41 = vstv %s1313_s16  ;;  %s928_s26 = sshll.u32 %s1489_s21, 3 }
  0x59   : > { %s1356_s29 = sld [smem:[#allocation5 + %s1263_s7]]  ;;  %v384_v35 = vmul.f32 16.0, %v382_v31  ;;  %v385_v36 = vsub.f32 %v368_v6, %v383_v28  ;;  %v390_v37 = vmul.f32 4.0, %v382_v31  ;;  %v405_v38 = vmul.f32 %v396_v18, %v389_v29 }
  0x5a   : > { %v472_v42 = vstv %s1322_s18  ;;  %v456_v48 = vrot.slane %v451_v40, %v1289_v9  ;;  %v460_v49 = vrot.slane %v451_v40, %v1291_v10  ;;  %s1367_s7 = sld [smem:[#allocation5 + %s1271_s27]]  ;;  %v479_v56 = vstv %s1330_s20 }
  0x5b   : > { %v386_v43 = vsub.f32 %v1283_v7, %v384_v35  ;;  %v387_v44 = vmul.f32 4.0, %v385_v36  ;;  %v406_v45 = vmul.f32 %v400_v19, %v390_v37  ;;  %v415_v46 = vmul.f32 %v414_v26, %v405_v38  ;;  %s1369_s11 = sld [smem:[#allocation8]] }
  0x5c   : > { %v444_v47 = vmul.f32 %v443_v33, %v405_v38  ;;  %v473_v50 = vmul.f32 %v472_v42, %v405_v38  ;;  %v495_v57 = vstv %s1338_s24  ;;  %v499_v58 = vstv %s1341_s28  ;;  %s1376_s13 = sld [smem:[#allocation5 + %s436_s9]]  ;;  %s359_s28 = scalar_lea.vmem %s1478_s6, %s928_s26 }
  0x5d   : > { %v388_v51 = vmul.f32 4.0, %v386_v43  ;;  %v403_v52 = vmul.f32 %v396_v18, %v387_v44  ;;  %v416_v53 = vmul.f32 %v414_v26, %v406_v45  ;;  %v445_v54 = vmul.f32 %v443_v33, %v406_v45  ;;  %s1380_s15 = sld [smem:[#allocation5 + %s441_s12]] }
  0x5e   : > { %v474_v55 = vmul.f32 %v472_v42, %v406_v45  ;;  %v480_v63 = vmul.f32 %v479_v56, %v1299_v14  ;;  %v503_v1 = vstv %s1346_s8  ;;  %v507_v2 = vstv %s1353_s19  ;;  %s1390_s27 = sld [smem:[#allocation5 + %s448_s14]] }
  0x5f   : > { %v404_v59 = vmul.f32 %v400_v19, %v388_v51  ;;  %v410_v60 = vmul.f32 %v409_v25, %v403_v52  ;;  %v439_v61 = vmul.f32 %v438_v30, %v403_v52  ;;  %v468_v62 = vmul.f32 %v467_v41, %v403_v52  ;;  %s1392_s9 = sld [smem:[#allocation8 + $0x1]] }
  0x60   : > { %v511_v3 = vstv %s1356_s29  ;;  %v485_v12 = vrot.slane %v480_v63, %v1289_v9  ;;  %v489_v13 = vrot.slane %v480_v63, %v1291_v10  ;;  %v517_v21 = vstv %s1367_s7  ;;  %s1398_s12 = sld [smem:[#allocation5 + %s465_s30]] }
  0x61   : > { %v411_v4 = vmul.f32 %v409_v25, %v404_v59  ;;  %v417_v5 = vadd.f32 %v415_v46, %v410_v60  ;;  %v440_v6 = vmul.f32 %v438_v30, %v404_v59  ;;  %v446_v7 = vadd.f32 %v444_v47, %v439_v61  ;;  %s1402_s16 = sld [smem:[#allocation5 + %s470_s17]] }
  0x62   : > { %v469_v8 = vmul.f32 %v467_v41, %v404_v59  ;;  %v475_v11 = vadd.f32 %v473_v50, %v468_v62  ;;  %v618_v22 = vstv %s1369_s11  ;;  %v523_v27 = vstv %s1376_s13  ;;  %s1408_s14 = sld [smem:[#allocation5 + %s477_s10]]  ;;  %s1429_s10 = scalar_lea.vmem %s1477_s5, %s928_s26 }
  0x63   : > { %v418_v14 = vadd.f32 %v416_v53, %v411_v4  ;;  %v434_v15 = vadd.f32 %v427_v32, %v417_v5  ;;  %v447_v16 = vadd.f32 %v445_v54, %v440_v6  ;;  %v463_v17 = vadd.f32 %v456_v48, %v446_v7  ;;  %s1416_s30 = sld [smem:[#allocation8 + $0x2]] }
  0x64   : > { %v476_v18 = vadd.f32 %v474_v55, %v469_v8  ;;  %v492_v19 = vadd.f32 %v485_v12, %v475_v11  ;;  %v527_v28 = vstv %s1380_s15  ;;  %v533_v45 = vstv %s1390_s27 }
  0x65   : > { %v435_v9 = vadd.f32 %v431_v39, %v418_v14  ;;  %v464_v10 = vadd.f32 %v460_v49, %v447_v16  ;;  %v496_v23 = vsub.f32 %v434_v15, %v495_v57  ;;  %v500_v24 = vsub.f32 %v463_v17, %v499_v58 }
  0x66   : > { %v493_v25 = vadd.f32 %v489_v13, %v476_v18  ;;  %v504_v26 = vsub.f32 %v492_v19, %v503_v1  ;;  %v636_v51 = vstv %s1392_s9  ;;  %v539_v52 = vstv %s1398_s12 }
  0x67   : > { %v497_v29 = vsub.f32 %v435_v9, %v495_v57  ;;  %v501_v30 = vsub.f32 %v464_v10, %v499_v58  ;;  %v508_v31 = vmul.f32 %v507_v2, %v496_v23  ;;  %v512_v32 = vmul.f32 %v511_v3, %v500_v24 }
  0x68   : > { %v505_v33 = vsub.f32 %v493_v25, %v503_v1  ;;  %v518_v34 = vmul.f32 %v517_v21, %v504_v26  ;;  %v524_v35 = vmul.f32 %v523_v27, %v496_v23  ;;  %v528_v36 = vmul.f32 %v527_v28, %v500_v24 }
  0x69   : > { %v509_v37 = vmul.f32 %v507_v2, %v497_v29  ;;  %v513_v38 = vmul.f32 %v511_v3, %v501_v30  ;;  %v514_v39 = vadd.f32 %v512_v32, %v508_v31  ;;  %v525_v40 = vmul.f32 %v523_v27, %v497_v29 }
  0x6a   : > { %v519_v41 = vmul.f32 %v517_v21, %v505_v33  ;;  %v529_v43 = vmul.f32 %v527_v28, %v501_v30  ;;  %v530_v44 = vadd.f32 %v528_v36, %v524_v35  ;;  %v534_v48 = vmul.f32 %v533_v45, %v504_v26 }
  0x6b   : > { %v515_v46 = vadd.f32 %v513_v38, %v509_v37  ;;  %v520_v47 = vadd.f32 %v518_v34, %v514_v39  ;;  %v535_v49 = vmul.f32 %v533_v45, %v505_v33  ;;  %v543_v53 = vstv %s1402_s16 }
  0x6c   : > { %v531_v50 = vadd.f32 %v529_v43, %v525_v40  ;;  %v536_v0 = vadd.f32 %v534_v48, %v530_v44  ;;  %v540_v56 = vmul.f32 %v539_v52, %v496_v23  ;;  %v541_v58 = vmul.f32 %v539_v52, %v497_v29 }
  0x6d   : > { %v521_v54 = vadd.f32 %v519_v41, %v515_v46  ;;  %v619_v55 = vsub.f32 %v520_v47, %v618_v22  ;;  %v544_v59 = vmul.f32 %v543_v53, %v500_v24  ;;  %v545_v60 = vmul.f32 %v543_v53, %v501_v30 }
  0x6e   : > { %v537_v57 = vadd.f32 %v535_v49, %v531_v50  ;;  %v637_v1 = vsub.f32 %v536_v0, %v636_v51  ;;  %v549_v11 = vstv %s1408_s14  ;;  %v654_v17 = vstv %s1416_s30 }
  0x6f   : > { %v556_v61 = vcombine.low %v520_v47, %v521_v54  ;;  %v620_v62 = vsub.f32 %v521_v54, %v618_v22  ;;  %v621_v63 = vmul.f32 25.0, %v619_v55  ;;  %v546_v4 = vadd.f32 %v544_v59, %v540_v56 }
  0x70   : > { %v579_v2 = vcombine.low %v536_v0, %v537_v57  ;;  %v638_v3 = vsub.f32 %v537_v57, %v636_v51  ;;  %v547_v5 = vadd.f32 %v545_v60, %v541_v58  ;;  %v639_v8 = vmul.f32 25.0, %v637_v1 }
  0x71   : > { %v563_v6 = vrot.slane %v556_v61, %v1325_v20  ;;  %v622_v7 = vmul.f32 25.0, %v620_v62  ;;  %v550_v14 = vmul.f32 %v549_v11, %v504_v26  ;;  %v551_v15 = vmul.f32 %v549_v11, %v505_v33 }
  0x72   : > { %v586_v12 = vrot.slane %v579_v2, %v1325_v20  ;;  %v640_v13 = vmul.f32 25.0, %v638_v3  ;;  %v623_v18 = vfloor.f32 %v621_v63  ;;  %v641_v10 = vfloor.f32 %v639_v8 }
  0x73   : > { %v570_v16 = vrot.slane %v563_v6, %v1325_v20  ;;  %v624_v19 = vfloor.f32 %v622_v7  ;;  %v552_v22 = vadd.f32 %v550_v14, %v546_v4  ;;  %v553_v9 = vadd.f32 %v551_v15, %v547_v5 }
  0x74   : > { %v593_v21 = vrot.slane %v586_v12, %v1325_v20  ;;  %v930_v23 = vtrunc.f32 %v623_v18  ;;  %v642_v25 = vfloor.f32 %v640_v13  ;;  %v934_v29 = vtrunc.f32 %v641_v10 }
  0x75   : > { %576 = vst.msk [vmem:[%s1429_s10] ss:$4 sm:$0x3] %vm1411_vm2, %v570_v16  ;;  %v932_v24 = vtrunc.f32 %v624_v19  ;;  %v599_v26 = vcombine.low %v552_v22, %v553_v9  ;;  %v655_v27 = vsub.f32 %v552_v22, %v654_v17  ;;  %v656_v28 = vsub.f32 %v553_v9, %v654_v17 }
  0x76   : > { %920 = vst.msk [vmem:[%s1429_s10 + $0x1] ss:$4 sm:$0x3] %vm1411_vm2, %v593_v21  ;;  %v931_v30 = vcvt.f32.s32 %v930_v23  ;;  %v936_v32 = vtrunc.f32 %v642_v25  ;;  %v935_v35 = vcvt.f32.s32 %v934_v29 }
  0x77   : > { %v933_v31 = vcvt.f32.s32 %v932_v24  ;;  %v606_v33 = vrot.slane %v599_v26, %v1325_v20  ;;  %v657_v34 = vmul.f32 25.0, %v655_v27  ;;  %v658_v36 = vmul.f32 25.0, %v656_v28 }
  0x78   : > { %vm627_vm3 = vcmp.gt.s32.totalorder %v931_v30, 0  ;;  %v937_v37 = vcvt.f32.s32 %v936_v32  ;;  %vm645_vm5 = vcmp.gt.s32.totalorder %v935_v35, 0 }
  0x79   : > { %vm629_vm4 = vcmp.gt.s32.totalorder %v933_v31, 0  ;;  %v613_v38 = vrot.slane %v606_v33, %v1325_v20  ;;  %v628_v39 = vsel %vm627_vm3, %v931_v30, 0  ;;  %v646_v41 = vsel %vm645_vm5, %v935_v35, 0 }
  0x7a   : > { %v630_v40 = vsel %vm629_vm4, %v933_v31, 0  ;;  %vm631_vm6 = vcmp.lt.s32.totalorder %v628_v39, 23  ;;  %vm647_vm8 = vcmp.gt.s32.totalorder %v937_v37, 0  ;;  %vm649_vm9 = vcmp.lt.s32.totalorder %v646_v41, 23 }
  0x7b   : > { %vm633_vm7 = vcmp.lt.s32.totalorder %v630_v40, 23  ;;  %921 = vst.msk [vmem:[%s1429_s10 + $0x2] ss:$4 sm:$0x3] %vm1411_vm2, %v613_v38  ;;  %v632_v43 = vsel %vm631_vm6, %v628_v39, 23  ;;  %v648_v45 = vsel %vm647_vm8, %v937_v37, 0  ;;  %v659_v48 = vfloor.f32 %v657_v34 }
  0x7c   : > { %v634_v44 = vsel %vm633_vm7, %v630_v40, 23  ;;  %v650_v47 = vsel %vm649_vm9, %v646_v41, 23  ;;  %vm651_vm10 = vcmp.lt.s32.totalorder %v648_v45, 23  ;;  %v660_v50 = vfloor.f32 %v658_v36 }
  0x7d   : > { %v671_v46 = vcombine.low %v632_v43, %v634_v44  ;;  %v652_v49 = vsel %vm651_vm10, %v648_v45, 23  ;;  %v938_v53 = vtrunc.f32 %v659_v48 }
  0x7e   : > { %v687_v52 = vcombine.low %v650_v47, %v652_v49  ;;  %v940_v54 = vtrunc.f32 %v660_v50 }
  0x7f   : > { %v678_v51 = vrot.slane %v671_v46, %v1325_v20  ;;  %v939_v56 = vcvt.f32.s32 %v938_v53 }
  0x80   : > { %v694_v0 = vrot.slane %v687_v52, %v1325_v20  ;;  %v941_v57 = vcvt.f32.s32 %v940_v54 }
  0x81   : > { %v685_v55 = vrot.slane %v678_v51, %v1325_v20  ;;  %vm663_vm11 = vcmp.gt.s32.totalorder %v939_v56, 0 }
  0x82   : > { %v701_v58 = vrot.slane %v694_v0, %v1325_v20  ;;  %v664_v59 = vsel %vm663_vm11, %v939_v56, 0  ;;  %vm665_vm12 = vcmp.gt.s32.totalorder %v941_v57, 0 }
  0x83   : > { %686 = vst.msk [vmem:[%s359_s28] ss:$4 sm:$0x3] %vm1411_vm2, %v685_v55  ;;  %v666_v60 = vsel %vm665_vm12, %v941_v57, 0  ;;  %vm667_vm13 = vcmp.lt.s32.totalorder %v664_v59, 23 }
  0x84   : > { %924 = vst.msk [vmem:[%s359_s28 + $0x1] ss:$4 sm:$0x3] %vm1411_vm2, %v701_v58  ;;  %v668_v61 = vsel %vm667_vm13, %v664_v59, 23  ;;  %vm669_vm14 = vcmp.lt.s32.totalorder %v666_v60, 23 }
  0x85   : > { %v670_v62 = vsel %vm669_vm14, %v666_v60, 23 }
  0x86   : > { %v704_v63 = vcombine.low %v668_v61, %v670_v62 }
  0x88   : > { %v711_v1 = vrot.slane %v704_v63, %v1325_v20 }
  0x8a   : > { %v718_v2 = vrot.slane %v711_v1, %v1325_v20 }
  0x8c   : > { %925 = vst.msk [vmem:[%s359_s28 + $0x2] ss:$4 sm:$0x3] %vm1411_vm2, %v718_v2 }
  0x8d PF: > { %s21_s23 = sadd.s32 1, %s1102_s23   ;;  %s1484_s21 = smov %s1098_s22 }
  0x8e   : > { %p18_p4 = scmp.ge.s32.totalorder %s21_s23, 4   ;;  %s1485_s22 = smov %s1487_s25 }
  0x90   :  { %20 = sbr.rel (!%p18_p4) target bundleno = 5 (0x5), region = 104 }
  0x97   :  { %776 = vsyncpa [#allocation3], 1 }
  0x98   :  { %778 = vsyncpa [#allocation3 + $0x1], 1 }
  0x99   :  { %779 = vsyncpa [#allocation7], 1 }
  0x9a   :  { %780 = vsyncpa [#allocation4], 1 }
  0x9b   :  { %782 = vsyncpa [#allocation4 + $0x1], 1 }
  0x9c   :  { %783 = vsyncpa [#allocation9], 1 }

</bundles_post_ra>
